<compile_context>
chip_gen: v5e
topology: v5e:2x2
jax: 0.10.0
libtpu: 0.0.40
codegen_flags: <defaults>
</compile_context>

<pallas_src>
import functools

import jax
import jax.numpy as jnp
from jax.experimental import pallas as pl
from jax.experimental.pallas import tpu as pltpu


# Contract the last dim of both operands: (1,H) x (bt,H) -> (1,bt)   ("A @ B^T").
_NT_DIMS = (((1,), (1,)), ((), ()))


def _mlp_kernel(x_ref, w1_ref, b1_ref, w2_ref, b2_ref, w3_ref, b3_ref,
                w4_ref, b4_ref, o_ref):
    f32 = jnp.float32
    bf16 = jnp.bfloat16

    # Layer 1: (bt, S) @ (S, H) -> (bt, H); bf16 MXU operands, f32 accumulation.
    # State is cast in-kernel so we don't pay an extra HBM pass for a bf16 copy of it.
    # TODO(synk): if a bundle dump at large B shows the vmatmul slot binding, move this
    # K=16 matmul onto the VPU as 16 unrolled broadcast-MACs (it wastes an MXU pass).
    x = x_ref[...].astype(bf16)
    h = jnp.dot(x, w1_ref[...], preferred_element_type=f32)
    h = jnp.maximum(h + b1_ref[...], 0.0)

    # Layer 2: (bt, H) @ (H, H)
    h = jnp.dot(h.astype(bf16), w2_ref[...], preferred_element_type=f32)
    h = jnp.maximum(h + b2_ref[...], 0.0)

    # Layer 3: (bt, H) @ (H, H)
    h = jnp.dot(h.astype(bf16), w3_ref[...], preferred_element_type=f32)
    h = jnp.maximum(h + b3_ref[...], 0.0)

    # Layer 4 (H -> 1): w4 kept as a (1, H) bf16 row and contracted against h's hidden
    # dim (same NT pattern as q @ k^T in flash attention).  The (1, bt) result puts the
    # batch on the lane dim, so the store is a full-width vst instead of (bt, 1)
    # lane-masked partial stores.  Both MXU operands are bf16; accumulation stays f32.
    # TODO(synk): confirm via pl.lower_as_mlir that this NT dot does not insert a
    # vxpose of h; if it does, fall back to jnp.dot(h_bf16, w4_col) -> (bt, 1).
    v = jax.lax.dot_general(w4_ref[...], h.astype(bf16), dimension_numbers=_NT_DIMS,
                            preferred_element_type=f32)
    v = v + b4_ref[...]                                  # (1, bt) + (1, 1)
    o_ref[...] = v.reshape(1, 1, -1).astype(o_ref.dtype)


def _round_up(x, m):
    return ((x + m - 1) // m) * m


def _pick_batch_tile(B, batch_tile):
    """Static (trace-time) batch-tile selection.

    * Small B (<= 256): one full-array block (always a legal block shape for any B).
    * Larger B: at least two tiles so the 'parallel' batch axis splits across v7x's two
      TensorCores; tiles are multiples of 256 (fills the 256-wide MXU on v6e/v7x and
      satisfies the (8, 128) block divisibility rule).
    """
    if B <= 256:
        return B
    bt = min(_round_up(batch_tile, 256), _round_up(pl.cdiv(B, 2), 256))
    return max(bt, 256)


@functools.partial(jax.jit, static_argnames=("batch_tile", "state_buffers"))
def value_network_forward(state, params, batch_tile=1024, state_buffers=2):
    """state: (B, state_dim); params: w1..w4 stored (in_features, out_features),
    b1..b4 as (1, out_features) / (1, 1).  Returns (B, 1) float32."""
    B, state_dim = state.shape
    hidden_dim = params["w1"].shape[1]

    bt = _pick_batch_tile(B, batch_tile)
    num_tiles = pl.cdiv(B, bt)

    bf16 = jnp.bfloat16
    w1 = params["w1"].astype(bf16)
    w2 = params["w2"].astype(bf16)
    w3 = params["w3"].astype(bf16)
    b1, b2, b3 = params["b1"], params["b2"], params["b3"]
    w4 = params["w4"].reshape(1, hidden_dim).astype(bf16)        # (1, H) bf16 row
    b4 = params["b4"].reshape(1, 1).astype(jnp.float32)

    tile_b = lambda i: (i, 0)      # state: tiled along batch
    full2 = lambda i: (0, 0)       # weights/biases: constant block index -> DMA'd once

    # v5e only: a third buffer on the (tiny) state tile hides DMA issue latency if the
    # trace shows exposed waits at step boundaries; leave at the default 2 elsewhere.
    if state_buffers != 2:
        state_spec = pl.BlockSpec((bt, state_dim), tile_b,
                                  pipeline_mode=pl.Buffered(state_buffers))
    else:
        state_spec = pl.BlockSpec((bt, state_dim), tile_b)

    out = pl.pallas_call(
        _mlp_kernel,
        out_shape=jax.ShapeDtypeStruct((num_tiles, 1, bt), jnp.float32),
        grid_spec=pltpu.PrefetchScalarGridSpec(
            num_scalar_prefetch=0,
            grid=(num_tiles,),
            in_specs=[
                state_spec,                                     # x (original dtype)
                pl.BlockSpec((state_dim, hidden_dim), full2),   # w1 bf16
                pl.BlockSpec((1, hidden_dim), full2),           # b1 f32
                pl.BlockSpec((hidden_dim, hidden_dim), full2),  # w2 bf16
                pl.BlockSpec((1, hidden_dim), full2),           # b2
                pl.BlockSpec((hidden_dim, hidden_dim), full2),  # w3 bf16
                pl.BlockSpec((1, hidden_dim), full2),           # b3
                pl.BlockSpec((1, hidden_dim), full2),           # w4 row bf16
                pl.BlockSpec((1, 1), full2),                    # b4
            ],
            # INVARIANT: the ragged last tile reads rows >= B as unspecified data and
            # writes garbage into the tail of this slab.  That is safe ONLY because the
            # wrapper slices [:B] immediately and rows are independent through the MLP;
            # never reduce over / consume the (num_tiles, 1, bt) slab before that slice.
            out_specs=pl.BlockSpec((1, 1, bt), lambda i: (i, 0, 0)),
        ),
        compiler_params=pltpu.CompilerParams(
            dimension_semantics=("parallel",)),
    )(state, w1, b1, w2, b2, w3, b3, w4, b4)

    # Lane-dense slab -> (B, 1); garbage rows from the ragged last tile are dropped.
    return out.reshape(num_tiles * bt, 1)[:B]


def init_value_network_params(key, state_dim, hidden_dim=128):
    """Synthetic init with the same layer shapes as ValueNetwork's nn.Linear stack
    (weights stored as (in_features, out_features), i.e. torch weight transposed)."""
    ks = jax.random.split(key, 8)

    def lin(kw, kb, fan_in, fan_out):
        bound = 1.0 / jnp.sqrt(fan_in)
        w = jax.random.uniform(kw, (fan_in, fan_out), jnp.float32, -bound, bound)
        b = jax.random.uniform(kb, (1, fan_out), jnp.float32, -bound, bound)
        return w, b

    w1, b1 = lin(ks[0], ks[1], state_dim, hidden_dim)
    w2, b2 = lin(ks[2], ks[3], hidden_dim, hidden_dim)
    w3, b3 = lin(ks[4], ks[5], hidden_dim, hidden_dim)
    w4, b4 = lin(ks[6], ks[7], hidden_dim, 1)
    return dict(w1=w1, b1=b1, w2=w2, b2=b2, w3=w3, b3=b3, w4=w4, b4=b4)


def _reference_forward(state, p):
    h = jnp.maximum(state @ p["w1"] + p["b1"], 0.0)
    h = jnp.maximum(h @ p["w2"] + p["b2"], 0.0)
    h = jnp.maximum(h @ p["w3"] + p["b3"], 0.0)
    return h @ p["w4"] + p["b4"]


if __name__ == "__main__":
    key = jax.random.PRNGKey(0)
    k_params, k_state = jax.random.split(key)

    # Small demo shapes; batch=300 exercises a 2-step ragged grid (bt=256; the second
    # tile covers rows 256..511, rows >= 300 are garbage and dropped by the [:B] slice).
    batch, state_dim, hidden_dim = 300, 16, 128
    params = init_value_network_params(k_params, state_dim, hidden_dim)
    state = jax.random.normal(k_state, (batch, state_dim), jnp.float32)

    out = value_network_forward(state, params)
    out = jax.block_until_ready(out)

    ref = _reference_forward(state, params)
    assert out.shape == (batch, 1), out.shape
    # bf16 weights/activations (f32 accumulation) => tolerance loosened vs f32 reference.
    max_err = float(jnp.max(jnp.abs(out - ref)))
    assert jnp.allclose(out, ref, atol=5e-2, rtol=5e-2), f"mismatch, max_err={max_err}"

    print("KERNEL_OK")
</pallas_src>

<mosaic_0001>
module attributes {stable_mosaic.version = 11 : i64} {
  func.func @_mlp_kernel(%arg0: i32, %arg1: memref<256x16xf32, #tpu.memory_space<vmem>>, %arg2: memref<16x128xbf16, #tpu.memory_space<vmem>>, %arg3: memref<1x128xf32, #tpu.memory_space<vmem>>, %arg4: memref<128x128xbf16, #tpu.memory_space<vmem>>, %arg5: memref<1x128xf32, #tpu.memory_space<vmem>>, %arg6: memref<128x128xbf16, #tpu.memory_space<vmem>>, %arg7: memref<1x128xf32, #tpu.memory_space<vmem>>, %arg8: memref<1x128xbf16, #tpu.memory_space<vmem>>, %arg9: memref<1x1xf32, #tpu.memory_space<vmem>>, %arg10: memref<1x1x256xf32, #tpu.memory_space<vmem>>) attributes {dimension_semantics = [#tpu.dimension_semantics<parallel>], iteration_bounds = array<i64: 2>, scalar_prefetch = 0 : i64, scratch_operands = 0 : i64, tpu.core_type = #tpu.core_type<tc>, window_params = [{transform_indices = @transform_0, window_bounds = array<i64: 256, 16>}, {pipeline_mode = #tpu.pipeline_mode<synchronous>, transform_indices = @transform_1, window_bounds = array<i64: 16, 128>}, {pipeline_mode = #tpu.pipeline_mode<synchronous>, transform_indices = @transform_2, window_bounds = array<i64: 1, 128>}, {pipeline_mode = #tpu.pipeline_mode<synchronous>, transform_indices = @transform_3, window_bounds = array<i64: 128, 128>}, {pipeline_mode = #tpu.pipeline_mode<synchronous>, transform_indices = @transform_4, window_bounds = array<i64: 1, 128>}, {pipeline_mode = #tpu.pipeline_mode<synchronous>, transform_indices = @transform_5, window_bounds = array<i64: 128, 128>}, {pipeline_mode = #tpu.pipeline_mode<synchronous>, transform_indices = @transform_6, window_bounds = array<i64: 1, 128>}, {pipeline_mode = #tpu.pipeline_mode<synchronous>, transform_indices = @transform_7, window_bounds = array<i64: 1, 128>}, {pipeline_mode = #tpu.pipeline_mode<synchronous>, transform_indices = @transform_8, window_bounds = array<i64: 1, 1>}, {transform_indices = @transform_9, window_bounds = array<i64: 1, 1, 256>}]} {
    %c0 = arith.constant 0 : index
    %c0_0 = arith.constant 0 : index
    %0 = vector.load %arg1[%c0, %c0_0] : memref<256x16xf32, #tpu.memory_space<vmem>>, vector<256x16xf32>
    %1 = arith.truncf %0 : vector<256x16xf32> to vector<256x16xbf16>
    %c0_1 = arith.constant 0 : index
    %c0_2 = arith.constant 0 : index
    %2 = vector.load %arg2[%c0_1, %c0_2] : memref<16x128xbf16, #tpu.memory_space<vmem>>, vector<16x128xbf16>
    %cst = arith.constant dense<0.000000e+00> : vector<256x128xf32>
    %3 = tpu.matmul %1, %2, %cst {dimension_numbers = #tpu.dot_dimension_numbers<[1], [0], [0], [1], [0, 0, 1, 1], [], []>} : vector<256x16xbf16>, vector<16x128xbf16>, vector<256x128xf32> -> vector<256x128xf32>
    %c0_3 = arith.constant 0 : index
    %c0_4 = arith.constant 0 : index
    %4 = vector.load %arg3[%c0_3, %c0_4] : memref<1x128xf32, #tpu.memory_space<vmem>>, vector<1x128xf32>
    %5 = vector.broadcast %4 : vector<1x128xf32> to vector<256x128xf32>
    %6 = arith.addf %3, %5 : vector<256x128xf32>
    %cst_5 = arith.constant 0.000000e+00 : f32
    %7 = vector.broadcast %cst_5 : f32 to vector<256x128xf32>
    %8 = arith.maximumf %6, %7 : vector<256x128xf32>
    %9 = arith.truncf %8 : vector<256x128xf32> to vector<256x128xbf16>
    %c0_6 = arith.constant 0 : index
    %c0_7 = arith.constant 0 : index
    %10 = vector.load %arg4[%c0_6, %c0_7] : memref<128x128xbf16, #tpu.memory_space<vmem>>, vector<128x128xbf16>
    %cst_8 = arith.constant dense<0.000000e+00> : vector<256x128xf32>
    %11 = tpu.matmul %9, %10, %cst_8 {dimension_numbers = #tpu.dot_dimension_numbers<[1], [0], [0], [1], [0, 0, 1, 1], [], []>} : vector<256x128xbf16>, vector<128x128xbf16>, vector<256x128xf32> -> vector<256x128xf32>
    %c0_9 = arith.constant 0 : index
    %c0_10 = arith.constant 0 : index
    %12 = vector.load %arg5[%c0_9, %c0_10] : memref<1x128xf32, #tpu.memory_space<vmem>>, vector<1x128xf32>
    %13 = vector.broadcast %12 : vector<1x128xf32> to vector<256x128xf32>
    %14 = arith.addf %11, %13 : vector<256x128xf32>
    %cst_11 = arith.constant 0.000000e+00 : f32
    %15 = vector.broadcast %cst_11 : f32 to vector<256x128xf32>
    %16 = arith.maximumf %14, %15 : vector<256x128xf32>
    %17 = arith.truncf %16 : vector<256x128xf32> to vector<256x128xbf16>
    %c0_12 = arith.constant 0 : index
    %c0_13 = arith.constant 0 : index
    %18 = vector.load %arg6[%c0_12, %c0_13] : memref<128x128xbf16, #tpu.memory_space<vmem>>, vector<128x128xbf16>
    %cst_14 = arith.constant dense<0.000000e+00> : vector<256x128xf32>
    %19 = tpu.matmul %17, %18, %cst_14 {dimension_numbers = #tpu.dot_dimension_numbers<[1], [0], [0], [1], [0, 0, 1, 1], [], []>} : vector<256x128xbf16>, vector<128x128xbf16>, vector<256x128xf32> -> vector<256x128xf32>
    %c0_15 = arith.constant 0 : index
    %c0_16 = arith.constant 0 : index
    %20 = vector.load %arg7[%c0_15, %c0_16] : memref<1x128xf32, #tpu.memory_space<vmem>>, vector<1x128xf32>
    %21 = vector.broadcast %20 : vector<1x128xf32> to vector<256x128xf32>
    %22 = arith.addf %19, %21 : vector<256x128xf32>
    %cst_17 = arith.constant 0.000000e+00 : f32
    %23 = vector.broadcast %cst_17 : f32 to vector<256x128xf32>
    %24 = arith.maximumf %22, %23 : vector<256x128xf32>
    %c0_18 = arith.constant 0 : index
    %c0_19 = arith.constant 0 : index
    %25 = vector.load %arg8[%c0_18, %c0_19] : memref<1x128xbf16, #tpu.memory_space<vmem>>, vector<1x128xbf16>
    %26 = arith.truncf %24 : vector<256x128xf32> to vector<256x128xbf16>
    %cst_20 = arith.constant dense<0.000000e+00> : vector<1x256xf32>
    %27 = tpu.matmul %25, %26, %cst_20 {dimension_numbers = #tpu.dot_dimension_numbers<[1], [1], [0], [0], [0, 0, 1, 0], [], []>} : vector<1x128xbf16>, vector<256x128xbf16>, vector<1x256xf32> -> vector<1x256xf32>
    %c0_21 = arith.constant 0 : index
    %c0_22 = arith.constant 0 : index
    %28 = vector.load %arg9[%c0_21, %c0_22] : memref<1x1xf32, #tpu.memory_space<vmem>>, vector<1x1xf32>
    %29 = vector.broadcast %28 : vector<1x1xf32> to vector<1x256xf32>
    %30 = arith.addf %27, %29 : vector<1x256xf32>
    %31 = vector.shape_cast %30 : vector<1x256xf32> to vector<1x1x256xf32>
    %c0_23 = arith.constant 0 : index
    %c0_24 = arith.constant 0 : index
    %c0_25 = arith.constant 0 : index
    %32 = vector.load %arg10[%c0_23, %c0_24, %c0_25] : memref<1x1x256xf32, #tpu.memory_space<vmem>>, vector<1x1x256xf32>
    tpu.vector_store %arg10[%c0_23, %c0_24, %c0_25], %31 {strides = array<i32>} : memref<1x1x256xf32, #tpu.memory_space<vmem>>, vector<1x1x256xf32>,
    return
  }
  func.func @transform_0(%arg0: i32) -> (i32, i32) {
    %c0_i32 = arith.constant 0 : i32
    %c0_i32_0 = arith.constant 0 : i32
    return %arg0, %c0_i32 : i32, i32
  }
  func.func @transform_1(%arg0: i32) -> (i32, i32) {
    %c0_i32 = arith.constant 0 : i32
    %c0_i32_0 = arith.constant 0 : i32
    %c0_i32_1 = arith.constant 0 : i32
    return %c0_i32, %c0_i32_0 : i32, i32
  }
  func.func @transform_2(%arg0: i32) -> (i32, i32) {
    %c0_i32 = arith.constant 0 : i32
    %c0_i32_0 = arith.constant 0 : i32
    %c0_i32_1 = arith.constant 0 : i32
    return %c0_i32, %c0_i32_0 : i32, i32
  }
  func.func @transform_3(%arg0: i32) -> (i32, i32) {
    %c0_i32 = arith.constant 0 : i32
    %c0_i32_0 = arith.constant 0 : i32
    %c0_i32_1 = arith.constant 0 : i32
    return %c0_i32, %c0_i32_0 : i32, i32
  }
  func.func @transform_4(%arg0: i32) -> (i32, i32) {
    %c0_i32 = arith.constant 0 : i32
    %c0_i32_0 = arith.constant 0 : i32
    %c0_i32_1 = arith.constant 0 : i32
    return %c0_i32, %c0_i32_0 : i32, i32
  }
  func.func @transform_5(%arg0: i32) -> (i32, i32) {
    %c0_i32 = arith.constant 0 : i32
    %c0_i32_0 = arith.constant 0 : i32
    %c0_i32_1 = arith.constant 0 : i32
    return %c0_i32, %c0_i32_0 : i32, i32
  }
  func.func @transform_6(%arg0: i32) -> (i32, i32) {
    %c0_i32 = arith.constant 0 : i32
    %c0_i32_0 = arith.constant 0 : i32
    %c0_i32_1 = arith.constant 0 : i32
    return %c0_i32, %c0_i32_0 : i32, i32
  }
  func.func @transform_7(%arg0: i32) -> (i32, i32) {
    %c0_i32 = arith.constant 0 : i32
    %c0_i32_0 = arith.constant 0 : i32
    %c0_i32_1 = arith.constant 0 : i32
    return %c0_i32, %c0_i32_0 : i32, i32
  }
  func.func @transform_8(%arg0: i32) -> (i32, i32) {
    %c0_i32 = arith.constant 0 : i32
    %c0_i32_0 = arith.constant 0 : i32
    %c0_i32_1 = arith.constant 0 : i32
    return %c0_i32, %c0_i32_0 : i32, i32
  }
  func.func @transform_9(%arg0: i32) -> (i32, i32, i32) {
    %c0_i32 = arith.constant 0 : i32
    %c0_i32_0 = arith.constant 0 : i32
    %c0_i32_1 = arith.constant 0 : i32
    return %arg0, %c0_i32, %c0_i32_0 : i32, i32, i32
  }
}

</mosaic_0001>

<bundles_post_ra>
// kernel: value_network_forward.1
= control target key start
LH: loop header
LB: loop body
LE: loop exit
PB: predicated region body
PF: predicated region fallthrough
CT: control target
= control target key end

     0   :  { %s1296_s11 = smov 0   ;;  %s1548_s0 = inlined_call_operand.vmem [shape: f32[300,16], index: 0, kind: input, shape index: {}]   ;;  %s1549_s1 = inlined_call_operand.vmem [shape: bf16[16,128], index: 1, kind: input, shape index: {}]   ;;  %s1550_s2 = inlined_call_operand.vmem [shape: f32[1,128], index: 2, kind: input, shape index: {}]   ;;  %s1551_s3 = inlined_call_operand.vmem [shape: bf16[128,128], index: 3, kind: input, shape index: {}]   ;;  %s1552_s4 = inlined_call_operand.vmem [shape: f32[1,128], index: 4, kind: input, shape index: {}]   ;;  %s1553_s5 = inlined_call_operand.vmem [shape: bf16[128,128], index: 5, kind: input, shape index: {}]   ;;  %s1554_s6 = inlined_call_operand.vmem [shape: f32[1,128], index: 6, kind: input, shape index: {}]   ;;  %s1555_s7 = inlined_call_operand.vmem [shape: bf16[1,128], index: 7, kind: input, shape index: {}]   ;;  %s1556_s8 = inlined_call_operand.<no memory space> [shape: f32[1,1], index: 8, kind: input, shape index: {}]   ;;  %s1557_s9 = inlined_call_operand.vmem [shape: f32[2,1,256], index: 9, kind: output, shape index: {}]  }
   0x1   :  { %v14_v0 = vstv %s1556_s8 }
   0x2   :  { %15 = vst [vmem:[#allocation2] sm:$0x1] %v14_v0 }
   0x3 LB: > { %s1302_s12 = sadd.s32 4294967295, %s1240_s11   ;;  %p1114_p0 = scmp.ge.s32.totalorder %s1240_s11, 1  ;;  %s1240_s11 = sphi %s1296_s11, %s21_s11  }
   0x4   : > { %p298_p1 = scmp.lt.s32.totalorder %s1240_s11, 3 }
   0x6   : > { %p299_p2 = pnand %p1114_p0, %p298_p1 }
   0x7   : > { %s1115_s8 = sshll.u32 (!%p299_p2), %s1302_s12, 5  ;;  %p351_p4 = scmp.lt.s32.totalorder (!%p299_p2), %s1302_s12, 1 }
   0x8   : > { %302 = sbr.rel (%p299_p2) target bundleno = 888 (0x378), region = 56  ;;  %p342_p3 = scmp.lt.s32.totalorder (!%p299_p2), %s1115_s8, 37 }
   0xd   : > { %v1204_v1 = vld [vmem:[%s1549_s1] sm:$0xff]  ;;  %s1559_s8 = smov (!%p342_p3, %s1115_s8), 37  ;;  %vm416_vm0 = vcmask 130048   ;;  %v1212_v17 = vld [vmem:[%s1551_s3 + $0x38] sm:$0xff]  ;;  %v1211_v21 = vld [vmem:[%s1551_s3 + $0x30] sm:$0xff]  ;;  %s1561_s12 = smov (!%p351_p4, %s1302_s12), 1 }
   0xe   : > { %472 = vmatpush.bf16.msra.mxu0 %v1204_v1  ;;  %s1116_s15 = sshll.u32 %s1559_s8, 3  ;;  %670 = vmatpush.bf16.msra.mxu1 %v1212_v17  ;;  %v1210_v22 = vld [vmem:[%s1551_s3 + $0x28] sm:$0xff]  ;;  %v1209_v23 = vld [vmem:[%s1551_s3 + $0x20] sm:$0xff]  ;;  %v1208_v26 = vld [vmem:[%s1551_s3 + $0x18] sm:$0xff]  ;;  %s1117_s20 = sshll.u32 %s1561_s12, 1  ;;  %vm1049_vm1 = vcmask 1040384  }
   0xf   : > { %s1313_s18 = scalar_lea.vmem %s1548_s0, %s1116_s15  ;;  %v1207_v28 = vld [vmem:[%s1551_s3 + $0x10] sm:$0xff]  ;;  %v1206_v29 = vld [vmem:[%s1551_s3 + $0x8] sm:$0xff]  ;;  %v1205_v30 = vld [vmem:[%s1551_s3] sm:$0xff]  ;;  %s354_s23 = scalar_lea.vmem %s1557_s9, %s1117_s20 }
  0x10   : > { %v356_v2 = vld [vmem:[%s1313_s18] sm:$0xff]  ;;  %v357_v3 = vld [vmem:[%s1313_s18 + $0x8] sm:$0xff]  ;;  %v358_v5 = vld [vmem:[%s1313_s18 + $0x10] sm:$0xff] }
  0x11   : > { %v388_v4 = vpack.c.bf16 %v357_v3, %v356_v2  ;;  %v359_v6 = vld [vmem:[%s1313_s18 + $0x18] sm:$0xff]  ;;  %v360_v8 = vld [vmem:[%s1313_s18 + $0x20] sm:$0xff]  ;;  %v361_v9 = vld [vmem:[%s1313_s18 + $0x28] sm:$0xff] }
  0x12   : > { %v389_v7 = vpack.c.bf16 %v359_v6, %v358_v5  ;;  %v390_v10 = vpack.c.bf16 %v361_v9, %v360_v8  ;;  %v362_v11 = vld [vmem:[%s1313_s18 + $0x30] sm:$0xff]  ;;  %v363_v12 = vld [vmem:[%s1313_s18 + $0x38] sm:$0xff]  ;;  %v364_v14 = vld [vmem:[%s1313_s18 + $0x40] sm:$0xff]  ;;  %671 = vmatpush.bf16.msra.mxu1 %v1211_v21 }
  0x13   : > { %1122 = vmatmul.msk.bf16.vlgmr.msra.gmra.mxu0 %vm416_vm0, %v388_v4  ;;  %v391_v13 = vpack.c.bf16 %v363_v12, %v362_v11  ;;  %v365_v15 = vld [vmem:[%s1313_s18 + $0x48] sm:$0xff]  ;;  %v366_v18 = vld [vmem:[%s1313_s18 + $0x50] sm:$0xff]  ;;  %v367_v19 = vld [vmem:[%s1313_s18 + $0x58] sm:$0xff] }
  0x14   : > { %v392_v16 = vpack.c.bf16 %v365_v15, %v364_v14  ;;  %v393_v20 = vpack.c.bf16 %v367_v19, %v366_v18  ;;  %v368_v24 = vld [vmem:[%s1313_s18 + $0x60] sm:$0xff]  ;;  %v369_v25 = vld [vmem:[%s1313_s18 + $0x68] sm:$0xff]  ;;  %v370_v31 = vld [vmem:[%s1313_s18 + $0x70] sm:$0xff] }
  0x15   : > { %v394_v27 = vpack.c.bf16 %v369_v25, %v368_v24  ;;  %v371_v32 = vld [vmem:[%s1313_s18 + $0x78] sm:$0xff]  ;;  %v372_v34 = vld [vmem:[%s1313_s18 + $0x80] sm:$0xff]  ;;  %v373_v35 = vld [vmem:[%s1313_s18 + $0x88] sm:$0xff] }
  0x16   : > { %672 = vmatpush.bf16.msra.mxu1 %v1210_v22  ;;  %v395_v33 = vpack.c.bf16 %v371_v32, %v370_v31  ;;  %v396_v36 = vpack.c.bf16 %v373_v35, %v372_v34  ;;  %v1368_v38 = vld [vmem:[%s1550_s2] ss:$0 sm:$0xff]  ;;  %v374_v44 = vld [vmem:[%s1313_s18 + $0x90] sm:$0xff]  ;;  %v375_v45 = vld [vmem:[%s1313_s18 + $0x98] sm:$0xff] }
  0x17   : > { %v397_v47 = vpack.c.bf16 %v375_v45, %v374_v44  ;;  %v376_v54 = vld [vmem:[%s1313_s18 + $0xa0] sm:$0xff]  ;;  %v377_v55 = vld [vmem:[%s1313_s18 + $0xa8] sm:$0xff]  ;;  %v378_v0 = vld [vmem:[%s1313_s18 + $0xb0] sm:$0xff] }
  0x18   : > { %v398_v57 = vpack.c.bf16 %v377_v55, %v376_v54  ;;  %v379_v1 = vld [vmem:[%s1313_s18 + $0xb8] sm:$0xff]  ;;  %v381_v11 = vld [vmem:[%s1313_s18 + $0xc8] sm:$0xff]  ;;  %v384_v31 = vld [vmem:[%s1313_s18 + $0xe0] sm:$0xff] }
  0x19   : > { %v399_v3 = vpack.c.bf16 %v379_v1, %v378_v0  ;;  %v383_v21 = vld [vmem:[%s1313_s18 + $0xd8] sm:$0xff]  ;;  %v385_v32 = vld [vmem:[%s1313_s18 + $0xe8] sm:$0xff]  ;;  %v1219_v34 = vld [vmem:[%s1553_s5 + $0x30] sm:$0xff] }
  0x1a   : > { %673 = vmatpush.bf16.msra.mxu1 %v1209_v23  ;;  %v402_v35 = vpack.c.bf16 %v385_v32, %v384_v31 }
  0x1e   : > { %674 = vmatpush.bf16.msra.mxu1 %v1208_v26 }
  0x22   : > { %675 = vmatpush.bf16.msra.mxu1 %v1207_v28  ;;  %v1220_v28 = vld [vmem:[%s1553_s5 + $0x38] sm:$0xff] }
  0x23   : > { %1123 = vmatmul.msk.bf16.gmra.mxu0 %vm416_vm0, %v389_v7  ;;  %875 = vmatpush.bf16.msra.mxu2 %v1220_v28 }
  0x26   : > { %676 = vmatpush.bf16.msra.mxu1 %v1206_v29 }
  0x27   : > { %876 = vmatpush.bf16.msra.mxu2 %v1219_v34 }
  0x2a   : > { %677 = vmatpush.bf16.msra.mxu1 %v1205_v30 }
  0x33   : > { %1124 = vmatmul.msk.bf16.gmra.mxu0 %vm416_vm0, %v390_v10  ;;  %v380_v10 = vld [vmem:[%s1313_s18 + $0xc0] sm:$0xff] }
  0x43   : > { %1125 = vmatmul.msk.bf16.gmra.mxu0 %vm416_vm0, %v391_v13  ;;  %v400_v13 = vpack.c.bf16 %v381_v11, %v380_v10 }
  0x53   : > { %1126 = vmatmul.msk.bf16.gmra.mxu0 %vm416_vm0, %v392_v16 }
  0x63   : > { %1127 = vmatmul.msk.bf16.gmra.mxu0 %vm416_vm0, %v393_v20  ;;  %v382_v20 = vld [vmem:[%s1313_s18 + $0xd0] sm:$0xff] }
  0x64   : > { %v401_v23 = vpack.c.bf16 %v383_v21, %v382_v20 }
  0x73   : > { %1128 = vmatmul.msk.bf16.gmra.mxu0 %vm416_vm0, %v394_v27 }
  0x83   : > { %1129 = vmatmul.msk.bf16.gmra.mxu0 %vm416_vm0, %v395_v33 }
  0x90   : > { %v474_v37 = vpop.f32.mrf.mxu0 }
  0x91   : > { %v475_v39 = vadd.f32 %v1368_v38, %v474_v37  ;;  %v1218_v37 = vld [vmem:[%s1553_s5 + $0x28] sm:$0xff] }
  0x92   : > { %877 = vmatpush.bf16.msra.mxu2 %v1218_v37 }
  0x93   : > { %1130 = vmatmul.msk.bf16.gmra.mxu0 %vm416_vm0, %v396_v36  ;;  %v554_v42 = vmax.f32 %v475_v39, 0.0  ;;  %v1217_v39 = vld [vmem:[%s1553_s5 + $0x20] sm:$0xff] }
  0x96   : > { %878 = vmatpush.bf16.msra.mxu2 %v1217_v39 }
  0x98   : > { %v476_v40 = vpop.f32.mrf.mxu0 }
  0x99   : > { %v477_v41 = vadd.f32 %v1368_v38, %v476_v40 }
  0x9b   : > { %v555_v43 = vmax.f32 %v477_v41, 0.0 }
  0x9d   : > { %v586_v46 = vpack.c.bf16 %v555_v43, %v554_v42  ;;  %v1216_v43 = vld [vmem:[%s1553_s5 + $0x18] sm:$0xff] }
  0x9e   : > { %879 = vmatpush.bf16.msra.mxu2 %v1216_v43 }
  0x9f   : > { %678 = vmatmul.bf16.vlgmr.msra.gmra.mxu1 %v586_v46  ;;  %v386_v46 = vld [vmem:[%s1313_s18 + $0xf0] sm:$0xff] }
  0xa0   : > { %v479_v48 = vpop.f32.mrf.mxu0 }
  0xa1   : > { %v480_v49 = vadd.f32 %v1368_v38, %v479_v48 }
  0xa3   : > { %1131 = vmatmul.msk.bf16.gmra.mxu0 %vm416_vm0, %v397_v47  ;;  %v556_v52 = vmax.f32 %v480_v49, 0.0  ;;  %v387_v47 = vld [vmem:[%s1313_s18 + $0xf8] sm:$0xff]  ;;  %v1215_v49 = vld [vmem:[%s1553_s5 + $0x10] sm:$0xff] }
  0xa4   : > { %880 = vmatpush.bf16.msra.mxu2 %v1215_v49 }
  0xa8   : > { %v481_v50 = vpop.f32.mrf.mxu0 }
  0xa9   : > { %v482_v51 = vadd.f32 %v1368_v38, %v481_v50  ;;  %v403_v50 = vpack.c.bf16 %v387_v47, %v386_v46 }
  0xab   : > { %v557_v53 = vmax.f32 %v482_v51, 0.0 }
  0xad   : > { %v587_v56 = vpack.c.bf16 %v557_v53, %v556_v52  ;;  %v1214_v52 = vld [vmem:[%s1553_s5 + $0x8] sm:$0xff]  ;;  %v1213_v53 = vld [vmem:[%s1553_s5] sm:$0xff] }
  0xae   : > { %881 = vmatpush.bf16.msra.mxu2 %v1214_v52 }
  0xaf   : > { %683 = vmatmul.bf16.gmra.mxu1 %v587_v56 }
  0xb0   : > { %v484_v58 = vpop.f32.mrf.mxu0 }
  0xb1   : > { %v485_v59 = vadd.f32 %v1368_v38, %v484_v58 }
  0xb2   : > { %882 = vmatpush.bf16.msra.mxu2 %v1213_v53 }
  0xb3   : > { %1132 = vmatmul.msk.bf16.gmra.mxu0 %vm416_vm0, %v398_v57  ;;  %v558_v62 = vmax.f32 %v485_v59, 0.0 }
  0xb8   : > { %v486_v60 = vpop.f32.mrf.mxu0 }
  0xb9   : > { %v487_v61 = vadd.f32 %v1368_v38, %v486_v60 }
  0xbb   : > { %v559_v63 = vmax.f32 %v487_v61, 0.0 }
  0xbd   : > { %v588_v2 = vpack.c.bf16 %v559_v63, %v558_v62 }
  0xbf   : > { %688 = vmatmul.bf16.gmra.mxu1 %v588_v2 }
  0xc0   : > { %v489_v4 = vpop.f32.mrf.mxu0 }
  0xc1   : > { %v490_v5 = vadd.f32 %v1368_v38, %v489_v4  ;;  %v1437_v4 = vld [vmem:[%s1552_s4] ss:$0 sm:$0xff] }
  0xc3   : > { %1133 = vmatmul.msk.bf16.gmra.mxu0 %vm416_vm0, %v399_v3  ;;  %v560_v8 = vmax.f32 %v490_v5, 0.0 }
  0xc8   : > { %v491_v6 = vpop.f32.mrf.mxu0 }
  0xc9   : > { %v492_v7 = vadd.f32 %v1368_v38, %v491_v6 }
  0xcb   : > { %v561_v9 = vmax.f32 %v492_v7, 0.0 }
  0xcd   : > { %v589_v12 = vpack.c.bf16 %v561_v9, %v560_v8 }
  0xcf   : > { %693 = vmatmul.bf16.gmra.mxu1 %v589_v12 }
  0xd0   : > { %v494_v14 = vpop.f32.mrf.mxu0 }
  0xd1   : > { %v495_v15 = vadd.f32 %v1368_v38, %v494_v14 }
  0xd3   : > { %1134 = vmatmul.msk.bf16.gmra.mxu0 %vm416_vm0, %v400_v13  ;;  %v562_v18 = vmax.f32 %v495_v15, 0.0 }
  0xd8   : > { %v496_v16 = vpop.f32.mrf.mxu0 }
  0xd9   : > { %v497_v17 = vadd.f32 %v1368_v38, %v496_v16 }
  0xdb   : > { %v563_v19 = vmax.f32 %v497_v17, 0.0 }
  0xdd   : > { %v590_v22 = vpack.c.bf16 %v563_v19, %v562_v18 }
  0xdf   : > { %698 = vmatmul.bf16.gmra.mxu1 %v590_v22 }
  0xe0   : > { %v499_v24 = vpop.f32.mrf.mxu0 }
  0xe1   : > { %v500_v25 = vadd.f32 %v1368_v38, %v499_v24 }
  0xe3   : > { %1135 = vmatmul.msk.bf16.gmra.mxu0 %vm416_vm0, %v401_v23  ;;  %v564_v29 = vmax.f32 %v500_v25, 0.0 }
  0xe8   : > { %v501_v26 = vpop.f32.mrf.mxu0 }
  0xe9   : > { %v502_v27 = vadd.f32 %v1368_v38, %v501_v26 }
  0xeb   : > { %v565_v30 = vmax.f32 %v502_v27, 0.0 }
  0xed   : > { %v591_v33 = vpack.c.bf16 %v565_v30, %v564_v29 }
  0xef   : > { %703 = vmatmul.bf16.gmra.mxu1 %v591_v33 }
  0xf0   : > { %v504_v36 = vpop.f32.mrf.mxu0 }
  0xf1   : > { %v505_v40 = vadd.f32 %v1368_v38, %v504_v36 }
  0xf3   : > { %1136 = vmatmul.msk.bf16.gmra.mxu0 %vm416_vm0, %v402_v35  ;;  %v566_v44 = vmax.f32 %v505_v40, 0.0 }
  0xf8   : > { %v506_v41 = vpop.f32.mrf.mxu0 }
  0xf9   : > { %v507_v42 = vadd.f32 %v1368_v38, %v506_v41 }
  0xfb   : > { %v567_v45 = vmax.f32 %v507_v42, 0.0 }
  0xfd   : > { %v592_v48 = vpack.c.bf16 %v567_v45, %v566_v44 }
  0xff   : > { %708 = vmatmul.bf16.gmra.mxu1 %v592_v48 }
 0x100   : > { %v509_v51 = vpop.f32.mrf.mxu0 }
 0x101   : > { %v510_v54 = vadd.f32 %v1368_v38, %v509_v51 }
 0x103   : > { %1137 = vmatmul.msk.bf16.gmra.mxu0 %vm416_vm0, %v403_v50  ;;  %v568_v57 = vmax.f32 %v510_v54, 0.0 }
 0x108   : > { %v511_v55 = vpop.f32.mrf.mxu0 }
 0x109   : > { %v512_v56 = vadd.f32 %v1368_v38, %v511_v55 }
 0x10b   : > { %v569_v58 = vmax.f32 %v512_v56, 0.0 }
 0x10d   : > { %v593_v59 = vpack.c.bf16 %v569_v58, %v568_v57 }
 0x10f   : > { %713 = vmatmul.bf16.gmra.mxu1 %v593_v59 }
 0x110   : > { %v514_v60 = vpop.f32.mrf.mxu0 }
 0x111   : > { %v515_v61 = vadd.f32 %v1368_v38, %v514_v60 }
 0x113   : > { %v570_v0 = vmax.f32 %v515_v61, 0.0 }
 0x118   : > { %v516_v62 = vpop.f32.mrf.mxu0 }
 0x119   : > { %v517_v63 = vadd.f32 %v1368_v38, %v516_v62 }
 0x11b   : > { %v571_v1 = vmax.f32 %v517_v63, 0.0 }
 0x11c   : > { %v679_v2 = vpop.f32.mrf.mxu1 }
 0x11d   : > { %v594_v3 = vpack.c.bf16 %v571_v1, %v570_v0  ;;  %v680_v6 = vadd.f32 %v1437_v4, %v679_v2 }
 0x11f   : > { %718 = vmatmul.bf16.gmra.mxu1 %v594_v3  ;;  %v759_v9 = vmax.f32 %v680_v6, 0.0 }
 0x120   : > { %v519_v5 = vpop.f32.mrf.mxu0 }
 0x121   : > { %v520_v10 = vadd.f32 %v1368_v38, %v519_v5 }
 0x123   : > { %v572_v15 = vmax.f32 %v520_v10, 0.0 }
 0x124   : > { %v681_v7 = vpop.f32.mrf.mxu1 }
 0x125   : > { %v682_v8 = vadd.f32 %v1437_v4, %v681_v7 }
 0x127   : > { %v760_v11 = vmax.f32 %v682_v8, 0.0 }
 0x128   : > { %v521_v12 = vpop.f32.mrf.mxu0 }
 0x129   : > { %v522_v13 = vadd.f32 %v1368_v38, %v521_v12  ;;  %v791_v14 = vpack.c.bf16 %v760_v11, %v759_v9 }
 0x12b   : > { %v573_v16 = vmax.f32 %v522_v13, 0.0  ;;  %883 = vmatmul.bf16.vlgmr.msra.gmra.mxu2 %v791_v14 }
 0x12c   : > { %v684_v17 = vpop.f32.mrf.mxu1 }
 0x12d   : > { %v595_v18 = vpack.c.bf16 %v573_v16, %v572_v15  ;;  %v685_v20 = vadd.f32 %v1437_v4, %v684_v17 }
 0x12f   : > { %723 = vmatmul.bf16.gmra.mxu1 %v595_v18  ;;  %v761_v23 = vmax.f32 %v685_v20, 0.0 }
 0x130   : > { %v524_v19 = vpop.f32.mrf.mxu0 }
 0x131   : > { %v525_v24 = vadd.f32 %v1368_v38, %v524_v19 }
 0x133   : > { %v574_v29 = vmax.f32 %v525_v24, 0.0 }
 0x134   : > { %v686_v21 = vpop.f32.mrf.mxu1 }
 0x135   : > { %v687_v22 = vadd.f32 %v1437_v4, %v686_v21 }
 0x137   : > { %v762_v25 = vmax.f32 %v687_v22, 0.0 }
 0x138   : > { %v526_v26 = vpop.f32.mrf.mxu0 }
 0x139   : > { %v527_v27 = vadd.f32 %v1368_v38, %v526_v26  ;;  %v792_v28 = vpack.c.bf16 %v762_v25, %v761_v23 }
 0x13b   : > { %v575_v30 = vmax.f32 %v527_v27, 0.0  ;;  %888 = vmatmul.bf16.gmra.mxu2 %v792_v28 }
 0x13c   : > { %v689_v31 = vpop.f32.mrf.mxu1 }
 0x13d   : > { %v596_v32 = vpack.c.bf16 %v575_v30, %v574_v29  ;;  %v690_v34 = vadd.f32 %v1437_v4, %v689_v31 }
 0x13f   : > { %728 = vmatmul.bf16.gmra.mxu1 %v596_v32  ;;  %v763_v37 = vmax.f32 %v690_v34, 0.0 }
 0x140   : > { %v529_v33 = vpop.f32.mrf.mxu0 }
 0x141   : > { %v530_v39 = vadd.f32 %v1368_v38, %v529_v33 }
 0x143   : > { %v576_v44 = vmax.f32 %v530_v39, 0.0 }
 0x144   : > { %v691_v35 = vpop.f32.mrf.mxu1 }
 0x145   : > { %v692_v36 = vadd.f32 %v1437_v4, %v691_v35 }
 0x147   : > { %v764_v40 = vmax.f32 %v692_v36, 0.0 }
 0x148   : > { %v531_v41 = vpop.f32.mrf.mxu0 }
 0x149   : > { %v532_v42 = vadd.f32 %v1368_v38, %v531_v41  ;;  %v793_v43 = vpack.c.bf16 %v764_v40, %v763_v37 }
 0x14b   : > { %v577_v45 = vmax.f32 %v532_v42, 0.0  ;;  %893 = vmatmul.bf16.gmra.mxu2 %v793_v43 }
 0x14c   : > { %v694_v46 = vpop.f32.mrf.mxu1 }
 0x14d   : > { %v597_v47 = vpack.c.bf16 %v577_v45, %v576_v44  ;;  %v695_v49 = vadd.f32 %v1437_v4, %v694_v46 }
 0x14f   : > { %733 = vmatmul.bf16.gmra.mxu1 %v597_v47  ;;  %v765_v52 = vmax.f32 %v695_v49, 0.0 }
 0x150   : > { %v534_v48 = vpop.f32.mrf.mxu0 }
 0x151   : > { %v535_v53 = vadd.f32 %v1368_v38, %v534_v48 }
 0x153   : > { %v578_v58 = vmax.f32 %v535_v53, 0.0 }
 0x154   : > { %v696_v50 = vpop.f32.mrf.mxu1 }
 0x155   : > { %v697_v51 = vadd.f32 %v1437_v4, %v696_v50 }
 0x157   : > { %v766_v54 = vmax.f32 %v697_v51, 0.0 }
 0x158   : > { %v536_v55 = vpop.f32.mrf.mxu0 }
 0x159   : > { %v537_v56 = vadd.f32 %v1368_v38, %v536_v55  ;;  %v794_v57 = vpack.c.bf16 %v766_v54, %v765_v52 }
 0x15b   : > { %v579_v59 = vmax.f32 %v537_v56, 0.0  ;;  %898 = vmatmul.bf16.gmra.mxu2 %v794_v57  ;;  %v1474_v56 = vld [vmem:[%s1554_s6] ss:$0 sm:$0xff] }
 0x15c   : > { %v699_v60 = vpop.f32.mrf.mxu1 }
 0x15d   : > { %v598_v61 = vpack.c.bf16 %v579_v59, %v578_v58  ;;  %v700_v63 = vadd.f32 %v1437_v4, %v699_v60 }
 0x15f   : > { %738 = vmatmul.bf16.gmra.mxu1 %v598_v61  ;;  %v767_v2 = vmax.f32 %v700_v63, 0.0 }
 0x160   : > { %v539_v62 = vpop.f32.mrf.mxu0 }
 0x161   : > { %v540_v3 = vadd.f32 %v1368_v38, %v539_v62 }
 0x163   : > { %v580_v9 = vmax.f32 %v540_v3, 0.0 }
 0x164   : > { %v701_v0 = vpop.f32.mrf.mxu1 }
 0x165   : > { %v702_v1 = vadd.f32 %v1437_v4, %v701_v0 }
 0x167   : > { %v768_v5 = vmax.f32 %v702_v1, 0.0 }
 0x168   : > { %v541_v6 = vpop.f32.mrf.mxu0 }
 0x169   : > { %v542_v7 = vadd.f32 %v1368_v38, %v541_v6  ;;  %v795_v8 = vpack.c.bf16 %v768_v5, %v767_v2 }
 0x16b   : > { %v581_v10 = vmax.f32 %v542_v7, 0.0  ;;  %903 = vmatmul.bf16.gmra.mxu2 %v795_v8 }
 0x16c   : > { %v704_v11 = vpop.f32.mrf.mxu1 }
 0x16d   : > { %v599_v12 = vpack.c.bf16 %v581_v10, %v580_v9  ;;  %v705_v14 = vadd.f32 %v1437_v4, %v704_v11 }
 0x16f   : > { %743 = vmatmul.bf16.gmra.mxu1 %v599_v12  ;;  %v769_v17 = vmax.f32 %v705_v14, 0.0 }
 0x170   : > { %v544_v13 = vpop.f32.mrf.mxu0 }
 0x171   : > { %v545_v18 = vadd.f32 %v1368_v38, %v544_v13 }
 0x173   : > { %v582_v23 = vmax.f32 %v545_v18, 0.0 }
 0x174   : > { %v706_v15 = vpop.f32.mrf.mxu1 }
 0x175   : > { %v707_v16 = vadd.f32 %v1437_v4, %v706_v15 }
 0x177   : > { %v770_v19 = vmax.f32 %v707_v16, 0.0 }
 0x178   : > { %v546_v20 = vpop.f32.mrf.mxu0 }
 0x179   : > { %v547_v21 = vadd.f32 %v1368_v38, %v546_v20  ;;  %v796_v22 = vpack.c.bf16 %v770_v19, %v769_v17 }
 0x17b   : > { %v583_v24 = vmax.f32 %v547_v21, 0.0  ;;  %908 = vmatmul.bf16.gmra.mxu2 %v796_v22 }
 0x17c   : > { %v709_v25 = vpop.f32.mrf.mxu1 }
 0x17d   : > { %v600_v26 = vpack.c.bf16 %v583_v24, %v582_v23  ;;  %v710_v28 = vadd.f32 %v1437_v4, %v709_v25 }
 0x17f   : > { %748 = vmatmul.bf16.gmra.mxu1 %v600_v26  ;;  %v771_v31 = vmax.f32 %v710_v28, 0.0 }
 0x180   : > { %v549_v27 = vpop.f32.mrf.mxu0 }
 0x181   : > { %v550_v32 = vadd.f32 %v1368_v38, %v549_v27 }
 0x183   : > { %v584_v37 = vmax.f32 %v550_v32, 0.0 }
 0x184   : > { %v711_v29 = vpop.f32.mrf.mxu1 }
 0x185   : > { %v712_v30 = vadd.f32 %v1437_v4, %v711_v29 }
 0x187   : > { %v772_v33 = vmax.f32 %v712_v30, 0.0 }
 0x188   : > { %v551_v34 = vpop.f32.mrf.mxu0 }
 0x189   : > { %v552_v35 = vadd.f32 %v1368_v38, %v551_v34  ;;  %v797_v36 = vpack.c.bf16 %v772_v33, %v771_v31 }
 0x18b   : > { %v585_v39 = vmax.f32 %v552_v35, 0.0  ;;  %913 = vmatmul.bf16.gmra.mxu2 %v797_v36 }
 0x18c   : > { %v714_v40 = vpop.f32.mrf.mxu1 }
 0x18d   : > { %v601_v41 = vpack.c.bf16 %v585_v39, %v584_v37  ;;  %v715_v42 = vadd.f32 %v1437_v4, %v714_v40 }
 0x18f   : > { %753 = vmatmul.bf16.gmra.mxu1 %v601_v41  ;;  %v773_v45 = vmax.f32 %v715_v42, 0.0 }
 0x194   : > { %v716_v43 = vpop.f32.mrf.mxu1 }
 0x195   : > { %v717_v44 = vadd.f32 %v1437_v4, %v716_v43 }
 0x197   : > { %v774_v46 = vmax.f32 %v717_v44, 0.0 }
 0x199   : > { %v798_v47 = vpack.c.bf16 %v774_v46, %v773_v45 }
 0x19b   : > { %918 = vmatmul.bf16.gmra.mxu2 %v798_v47 }
 0x19c   : > { %v719_v48 = vpop.f32.mrf.mxu1 }
 0x19d   : > { %v720_v49 = vadd.f32 %v1437_v4, %v719_v48 }
 0x19f   : > { %v775_v51 = vmax.f32 %v720_v49, 0.0 }
 0x1a4   : > { %v721_v38 = vpop.f32.mrf.mxu1 }
 0x1a5   : > { %v722_v50 = vadd.f32 %v1437_v4, %v721_v38 }
 0x1a7   : > { %v776_v52 = vmax.f32 %v722_v50, 0.0 }
 0x1a9   : > { %v799_v53 = vpack.c.bf16 %v776_v52, %v775_v51 }
 0x1ab   : > { %923 = vmatmul.bf16.gmra.mxu2 %v799_v53 }
 0x1ac   : > { %v724_v54 = vpop.f32.mrf.mxu1 }
 0x1ad   : > { %v725_v57 = vadd.f32 %v1437_v4, %v724_v54 }
 0x1ae   : > { %v884_v55 = vpop.f32.mrf.mxu2 }
 0x1af   : > { %v885_v59 = vadd.f32 %v1474_v56, %v884_v55  ;;  %v777_v62 = vmax.f32 %v725_v57, 0.0 }
 0x1b1   : > { %v964_v1 = vmax.f32 %v885_v59, 0.0 }
 0x1b4   : > { %v726_v58 = vpop.f32.mrf.mxu1 }
 0x1b5   : > { %v727_v60 = vadd.f32 %v1437_v4, %v726_v58 }
 0x1b6   : > { %v886_v61 = vpop.f32.mrf.mxu2 }
 0x1b7   : > { %v778_v63 = vmax.f32 %v727_v60, 0.0  ;;  %v887_v0 = vadd.f32 %v1474_v56, %v886_v61 }
 0x1b9   : > { %v965_v2 = vmax.f32 %v887_v0, 0.0  ;;  %v800_v3 = vpack.c.bf16 %v778_v63, %v777_v62 }
 0x1bb   : > { %928 = vmatmul.bf16.gmra.mxu2 %v800_v3  ;;  %v1480_v5 = vpack.c.bf16 %v965_v2, %v964_v1 }
 0x1bc   : > { %v729_v6 = vpop.f32.mrf.mxu1 }
 0x1bd   : > { %v730_v8 = vadd.f32 %v1437_v4, %v729_v6 }
 0x1be   : > { %v889_v7 = vpop.f32.mrf.mxu2 }
 0x1bf   : > { %v890_v10 = vadd.f32 %v1474_v56, %v889_v7  ;;  %v779_v13 = vmax.f32 %v730_v8, 0.0 }
 0x1c1   : > { %v966_v16 = vmax.f32 %v890_v10, 0.0 }
 0x1c4   : > { %v731_v9 = vpop.f32.mrf.mxu1 }
 0x1c5   : > { %v732_v11 = vadd.f32 %v1437_v4, %v731_v9 }
 0x1c6   : > { %v891_v12 = vpop.f32.mrf.mxu2 }
 0x1c7   : > { %v780_v14 = vmax.f32 %v732_v11, 0.0  ;;  %v892_v15 = vadd.f32 %v1474_v56, %v891_v12 }
 0x1c9   : > { %v967_v17 = vmax.f32 %v892_v15, 0.0  ;;  %v801_v18 = vpack.c.bf16 %v780_v14, %v779_v13 }
 0x1cb   : > { %933 = vmatmul.bf16.gmra.mxu2 %v801_v18  ;;  %v1486_v19 = vpack.c.bf16 %v967_v17, %v966_v16 }
 0x1cc   : > { %v734_v20 = vpop.f32.mrf.mxu1 }
 0x1cd   : > { %v735_v22 = vadd.f32 %v1437_v4, %v734_v20 }
 0x1ce   : > { %v894_v21 = vpop.f32.mrf.mxu2 }
 0x1cf   : > { %v895_v24 = vadd.f32 %v1474_v56, %v894_v21  ;;  %v781_v27 = vmax.f32 %v735_v22, 0.0 }
 0x1d1   : > { %v968_v30 = vmax.f32 %v895_v24, 0.0 }
 0x1d4   : > { %v736_v23 = vpop.f32.mrf.mxu1 }
 0x1d5   : > { %v737_v25 = vadd.f32 %v1437_v4, %v736_v23 }
 0x1d6   : > { %v896_v26 = vpop.f32.mrf.mxu2 }
 0x1d7   : > { %v782_v28 = vmax.f32 %v737_v25, 0.0  ;;  %v897_v29 = vadd.f32 %v1474_v56, %v896_v26 }
 0x1d9   : > { %v969_v31 = vmax.f32 %v897_v29, 0.0  ;;  %v802_v32 = vpack.c.bf16 %v782_v28, %v781_v27 }
 0x1db   : > { %938 = vmatmul.bf16.gmra.mxu2 %v802_v32  ;;  %v1492_v33 = vpack.c.bf16 %v969_v31, %v968_v30 }
 0x1dc   : > { %v739_v34 = vpop.f32.mrf.mxu1 }
 0x1dd   : > { %v740_v36 = vadd.f32 %v1437_v4, %v739_v34 }
 0x1de   : > { %v899_v35 = vpop.f32.mrf.mxu2 }
 0x1df   : > { %v900_v39 = vadd.f32 %v1474_v56, %v899_v35  ;;  %v783_v42 = vmax.f32 %v740_v36, 0.0 }
 0x1e1   : > { %v970_v45 = vmax.f32 %v900_v39, 0.0 }
 0x1e4   : > { %v741_v37 = vpop.f32.mrf.mxu1 }
 0x1e5   : > { %v742_v40 = vadd.f32 %v1437_v4, %v741_v37 }
 0x1e6   : > { %v901_v41 = vpop.f32.mrf.mxu2 }
 0x1e7   : > { %v784_v43 = vmax.f32 %v742_v40, 0.0  ;;  %v902_v44 = vadd.f32 %v1474_v56, %v901_v41 }
 0x1e9   : > { %v803_v46 = vpack.c.bf16 %v784_v43, %v783_v42  ;;  %v971_v47 = vmax.f32 %v902_v44, 0.0 }
 0x1eb   : > { %943 = vmatmul.bf16.gmra.mxu2 %v803_v46  ;;  %v1498_v48 = vpack.c.bf16 %v971_v47, %v970_v45 }
 0x1ec   : > { %v744_v49 = vpop.f32.mrf.mxu1 }
 0x1ed   : > { %v745_v50 = vadd.f32 %v1437_v4, %v744_v49 }
 0x1ee   : > { %v904_v38 = vpop.f32.mrf.mxu2 }
 0x1ef   : > { %v905_v52 = vadd.f32 %v1474_v56, %v904_v38  ;;  %v785_v55 = vmax.f32 %v745_v50, 0.0 }
 0x1f1   : > { %v972_v59 = vmax.f32 %v905_v52, 0.0 }
 0x1f4   : > { %v746_v51 = vpop.f32.mrf.mxu1 }
 0x1f5   : > { %v747_v53 = vadd.f32 %v1437_v4, %v746_v51 }
 0x1f6   : > { %v906_v54 = vpop.f32.mrf.mxu2 }
 0x1f7   : > { %v786_v57 = vmax.f32 %v747_v53, 0.0  ;;  %v907_v58 = vadd.f32 %v1474_v56, %v906_v54 }
 0x1f9   : > { %v804_v60 = vpack.c.bf16 %v786_v57, %v785_v55  ;;  %v973_v61 = vmax.f32 %v907_v58, 0.0 }
 0x1fb   : > { %948 = vmatmul.bf16.gmra.mxu2 %v804_v60  ;;  %v1001_v62 = vpack.c.bf16 %v973_v61, %v972_v59 }
 0x1fc   : > { %v749_v63 = vpop.f32.mrf.mxu1 }
 0x1fd   : > { %v750_v1 = vadd.f32 %v1437_v4, %v749_v63 }
 0x1fe   : > { %v909_v0 = vpop.f32.mrf.mxu2 }
 0x1ff   : > { %v787_v7 = vmax.f32 %v750_v1, 0.0  ;;  %v910_v34 = vadd.f32 %v1474_v56, %v909_v0 }
 0x201   : > { %v974_v40 = vmax.f32 %v910_v34, 0.0 }
 0x204   : > { %v751_v2 = vpop.f32.mrf.mxu1 }
 0x205   : > { %v752_v3 = vadd.f32 %v1437_v4, %v751_v2 }
 0x206   : > { %v911_v6 = vpop.f32.mrf.mxu2 }
 0x207   : > { %v788_v8 = vmax.f32 %v752_v3, 0.0  ;;  %v912_v31 = vadd.f32 %v1474_v56, %v911_v6 }
 0x209   : > { %v805_v9 = vpack.c.bf16 %v788_v8, %v787_v7  ;;  %v975_v37 = vmax.f32 %v912_v31, 0.0  ;;  %v1242_v31 = vmov 0  }
 0x20a   : > { %1230 = vset.pattern.permute.xlu0 %v1242_v31 }
 0x20b   : > { %953 = vmatmul.bf16.gmra.mxu2 %v805_v9  ;;  %v1002_v43 = vpack.c.bf16 %v975_v37, %v974_v40 }
 0x20c   : > { %v754_v10 = vpop.f32.mrf.mxu1 }
 0x20d   : > { %v755_v12 = vadd.f32 %v1437_v4, %v754_v10 }
 0x20e   : > { %v914_v11 = vpop.f32.mrf.mxu2 }
 0x20f   : > { %v789_v16 = vmax.f32 %v755_v12, 0.0  ;;  %v915_v28 = vadd.f32 %v1474_v56, %v914_v11 }
 0x211   : > { %v976_v30 = vmax.f32 %v915_v28, 0.0 }
 0x214   : > { %v756_v13 = vpop.f32.mrf.mxu1 }
 0x215   : > { %v757_v14 = vadd.f32 %v1437_v4, %v756_v13 }
 0x216   : > { %v916_v15 = vpop.f32.mrf.mxu2 }
 0x217   : > { %v790_v17 = vmax.f32 %v757_v14, 0.0  ;;  %v917_v26 = vadd.f32 %v1474_v56, %v916_v15 }
 0x219   : > { %v806_v18 = vpack.c.bf16 %v790_v17, %v789_v16  ;;  %v977_v29 = vmax.f32 %v917_v26, 0.0 }
 0x21b   : > { %958 = vmatmul.bf16.gmra.mxu2 %v806_v18  ;;  %v1003_v32 = vpack.c.bf16 %v977_v29, %v976_v30  ;;  %v1013_v30 = vld [vmem:[#allocation2] sm:$0x1] }
 0x21c   : > { %1016 = vperm.xlu0 %1230, %v1013_v30  }
 0x21e   : > { %v919_v20 = vpop.f32.mrf.mxu2 }
 0x21f   : > { %v920_v21 = vadd.f32 %v1474_v56, %v919_v20 }
 0x221   : > { %v978_v24 = vmax.f32 %v920_v21, 0.0 }
 0x226   : > { %v921_v22 = vpop.f32.mrf.mxu2 }
 0x227   : > { %v922_v23 = vadd.f32 %v1474_v56, %v921_v22  ;;  %v996_v22 = vld [vmem:[%s1555_s7] sm:$0x1] }
 0x229   : > { %v979_v25 = vmax.f32 %v922_v23, 0.0 }
 0x22b   : > { %v1004_v27 = vpack.c.bf16 %v979_v25, %v978_v24 }
 0x22d   : > { %1020 = vmatpush.bf16.xpose.msra.mxu3 %v1004_v27 }
 0x22e   : > { %v924_v4 = vpop.f32.mrf.mxu2 }
 0x22f   : > { %v925_v35 = vadd.f32 %v1474_v56, %v924_v4 }
 0x231   : > { %v980_v41 = vmax.f32 %v925_v35, 0.0 }
 0x235   : > { %1021 = vmatpush.bf16.xpose.msra.mxu3 %v1003_v32 }
 0x236   : > { %v926_v36 = vpop.f32.mrf.mxu2 }
 0x237   : > { %v927_v39 = vadd.f32 %v1474_v56, %v926_v36  ;;  %v1052_v36 = vlaneseq }
 0x239   : > { %v981_v42 = vmax.f32 %v927_v39, 0.0  ;;  %vm1054_vm2 = vcmp.lt.s32.totalorder %v1052_v36, 256 }
 0x23b   : > { %v1516_v44 = vpack.c.bf16 %v981_v42, %v980_v41 }
 0x23d   : > { %1022 = vmatpush.bf16.xpose.msra.mxu3 %v1002_v43 }
 0x23e   : > { %v929_v45 = vpop.f32.mrf.mxu2 }
 0x23f   : > { %v930_v46 = vadd.f32 %v1474_v56, %v929_v45 }
 0x241   : > { %v982_v38 = vmax.f32 %v930_v46, 0.0 }
 0x245   : > { %1023 = vmatpush.bf16.xpose.msra.mxu3 %v1001_v62 }
 0x246   : > { %v931_v47 = vpop.f32.mrf.mxu2 }
 0x247   : > { %v932_v49 = vadd.f32 %v1474_v56, %v931_v47 }
 0x249   : > { %v983_v50 = vmax.f32 %v932_v49, 0.0 }
 0x24b   : > { %v1006_v51 = vpack.c.bf16 %v983_v50, %v982_v38 }
 0x24d   : > { %1024 = vmatpush.bf16.xpose.msra.mxu3 %v1498_v48 }
 0x24e   : > { %v934_v52 = vpop.f32.mrf.mxu2 }
 0x24f   : > { %v935_v53 = vadd.f32 %v1474_v56, %v934_v52 }
 0x251   : > { %v984_v57 = vmax.f32 %v935_v53, 0.0 }
 0x255   : > { %1025 = vmatpush.bf16.xpose.msra.mxu3 %v1492_v33 }
 0x256   : > { %v936_v54 = vpop.f32.mrf.mxu2 }
 0x257   : > { %v937_v55 = vadd.f32 %v1474_v56, %v936_v54 }
 0x259   : > { %v985_v58 = vmax.f32 %v937_v55, 0.0 }
 0x25b   : > { %v1007_v59 = vpack.c.bf16 %v985_v58, %v984_v57 }
 0x25d   : > { %1026 = vmatpush.bf16.xpose.msra.mxu3 %v1486_v19 }
 0x25e   : > { %v939_v60 = vpop.f32.mrf.mxu2 }
 0x25f   : > { %v940_v61 = vadd.f32 %v1474_v56, %v939_v60 }
 0x261   : > { %v986_v63 = vmax.f32 %v940_v61, 0.0 }
 0x265   : > { %1027 = vmatpush.bf16.xpose.msra.mxu3 %v1480_v5 }
 0x266   : > { %v941_v62 = vpop.f32.mrf.mxu2 }
 0x267   : > { %v942_v48 = vadd.f32 %v1474_v56, %v941_v62 }
 0x269   : > { %v987_v0 = vmax.f32 %v942_v48, 0.0 }
 0x26b   : > { %v1008_v1 = vpack.c.bf16 %v987_v0, %v986_v63 }
 0x26c   : > { %1028 = vmatmul.bf16.vlgmr.msra.gmra.mxu3 %v996_v22 }
 0x26e   : > { %v944_v33 = vpop.f32.mrf.mxu2 }
 0x26f   : > { %v945_v2 = vadd.f32 %v1474_v56, %v944_v33 }
 0x271   : > { %v988_v7 = vmax.f32 %v945_v2, 0.0 }
 0x276   : > { %v946_v3 = vpop.f32.mrf.mxu2 }
 0x277   : > { %v947_v6 = vadd.f32 %v1474_v56, %v946_v3 }
 0x279   : > { %v989_v8 = vmax.f32 %v947_v6, 0.0 }
 0x27b   : > { %v1009_v19 = vpack.c.bf16 %v989_v8, %v988_v7 }
 0x27e   : > { %v949_v9 = vpop.f32.mrf.mxu2 }
 0x27f   : > { %v950_v27 = vadd.f32 %v1474_v56, %v949_v9 }
 0x281   : > { %v990_v4 = vmax.f32 %v950_v27, 0.0 }
 0x286   : > { %v951_v10 = vpop.f32.mrf.mxu2 }
 0x287   : > { %v952_v25 = vadd.f32 %v1474_v56, %v951_v10 }
 0x289   : > { %v991_v28 = vmax.f32 %v952_v25, 0.0 }
 0x28b   : > { %v1010_v29 = vpack.c.bf16 %v991_v28, %v990_v4 }
 0x28e   : > { %v954_v11 = vpop.f32.mrf.mxu2  ;;  %v1017_v34 = vpop.permute.xlu0 %1016 }
 0x28f   : > { %v955_v21 = vadd.f32 %v1474_v56, %v954_v11  ;;  %v1019_v35 = vperm.slane %v1017_v34, 0 }
 0x291   : > { %v992_v24 = vmax.f32 %v955_v21, 0.0 }
 0x296   : > { %v956_v12 = vpop.f32.mrf.mxu2 }
 0x297   : > { %v957_v18 = vadd.f32 %v1474_v56, %v956_v12 }
 0x299   : > { %v993_v23 = vmax.f32 %v957_v18, 0.0 }
 0x29b   : > { %v1011_v26 = vpack.c.bf16 %v993_v23, %v992_v24 }
 0x29e   : > { %v959_v5 = vpop.f32.mrf.mxu2 }
 0x29f   : > { %v960_v13 = vadd.f32 %v1474_v56, %v959_v5 }
 0x2a1   : > { %v994_v16 = vmax.f32 %v960_v13, 0.0 }
 0x2a6   : > { %v961_v14 = vpop.f32.mrf.mxu2 }
 0x2a7   : > { %v962_v15 = vadd.f32 %v1474_v56, %v961_v14 }
 0x2a9   : > { %v995_v17 = vmax.f32 %v962_v15, 0.0 }
 0x2ab   : > { %v1012_v20 = vpack.c.bf16 %v995_v17, %v994_v16 }
 0x2ad   : > { %1033 = vmatpush.bf16.xpose.msrb.mxu3 %v1012_v20 }
 0x2b5   : > { %1034 = vmatpush.bf16.xpose.msrb.mxu3 %v1011_v26 }
 0x2bd   : > { %1035 = vmatpush.bf16.xpose.msrb.mxu3 %v1010_v29 }
 0x2c5   : > { %1036 = vmatpush.bf16.xpose.msrb.mxu3 %v1009_v19 }
 0x2cd   : > { %1037 = vmatpush.bf16.xpose.msrb.mxu3 %v1008_v1 }
 0x2d5   : > { %1038 = vmatpush.bf16.xpose.msrb.mxu3 %v1007_v59 }
 0x2dd   : > { %1039 = vmatpush.bf16.xpose.msrb.mxu3 %v1006_v51 }
 0x2e5   : > { %1040 = vmatpush.bf16.xpose.msrb.mxu3 %v1516_v44 }
 0x2ec   : > { %1041 = vmatmul.bf16.vlgmr.msrb.gmra.mxu3 %v996_v22 }
 0x2ef   : > { %v1029_v32 = vpop.f32.mrf.mxu3 }
 0x2f0   : > { %v1030_v40 = vadd.f32 %v1029_v32, %v1019_v35 }
 0x2f7   : > { %v1031_v56 = vpop.f32.mrf.mxu3 }
 0x36f   : > { %v1042_v37 = vpop.f32.mrf.mxu3 }
 0x370   : > { %v1043_v39 = vadd.f32 %v1042_v37, %v1019_v35 }
 0x372   : > { %v1048_v41 = vrot.slane %v1043_v39, 7 }
 0x374   : > { %v1050_v42 = vsel %vm1049_vm1, %v1030_v40, %v1048_v41 }
 0x375   : > { %1056 = vst.msk [vmem:[%s354_s23] sm:$0x3] %vm1054_vm2, %v1050_v42 }
 0x377   : > { %v1044_v43 = vpop.f32.mrf.mxu3 }
 0x378 PF: > { %s21_s11 = sadd.s32 1, %s1240_s11  }
 0x379   : > { %p18_p5 = scmp.ge.s32.totalorder %s21_s11, 4  }
 0x37b   :  { %20 = sbr.rel (!%p18_p5) target bundleno = 3 (0x3), region = 86 }

</bundles_post_ra>
